<compile_context>
chip_gen: v6e
topology: v6e:2x2x1
jax: 0.10.0
libtpu: 0.0.40
codegen_flags: <defaults>
</compile_context>

<pallas_src>
import functools

import jax
import jax.numpy as jnp
from jax.experimental import pallas as pl
from jax.experimental.pallas import tpu as pltpu

LEAKY_SLOPE = 0.01  # torch.nn.LeakyReLU default


def _round_up(x, m):
    return (x + m - 1) // m * m


# --------------------------------------------------------------------------
# Kernel
# --------------------------------------------------------------------------
def _critic_kernel(num_layers, *refs):
    """Fused MLP: split first matmul + chain of (matmul + bias + LeakyReLU).

    refs = (state, action, Ws0, Wa0, b0, W1, b1, ..., W_{L-1}, b_{L-1}, out)
    Weights are already [in, out]; biases are [1, out]; the output block is
    the true [tile_b, out_dim] (no lane zero-padding).
    """
    s_ref, a_ref = refs[0], refs[1]
    o_ref = refs[-1]
    ws0_ref, wa0_ref, b0_ref = refs[2], refs[3], refs[4]

    # Layer 0: replaces cat([state, action]) @ W0.T + b0 without any concat.
    x = (jnp.dot(s_ref[...], ws0_ref[...], preferred_element_type=jnp.float32)
         + jnp.dot(a_ref[...], wa0_ref[...], preferred_element_type=jnp.float32)
         + b0_ref[...])
    if num_layers > 1:
        x = jnp.maximum(x, LEAKY_SLOPE * x)  # LeakyReLU (slope < 1)

    for i in range(1, num_layers):
        w = refs[5 + 2 * (i - 1)][...]  # [in_i, out_i]
        b = refs[6 + 2 * (i - 1)][...]  # [1, out_i]
        x = jnp.dot(x, w, preferred_element_type=jnp.float32) + b
        if i < num_layers - 1:          # LeakyReLU on hidden layers only
            x = jnp.maximum(x, LEAKY_SLOPE * x)

    # True-width store. For tiny out_dim this is a masked vst (cheap); for a
    # fully lane-dense writeback at huge B one could transpose here (XLU
    # vxpose is a free slot) and emit a [out_dim, B] output instead.
    o_ref[...] = x.astype(o_ref.dtype)


# --------------------------------------------------------------------------
# Host-side parameter prep (do ONCE, not per forward call)
# --------------------------------------------------------------------------
def prepare_critic_params(weights, biases, state_dim, param_dtype=jnp.float32):
    """Transpose weights to [in, out] and split layer 0 into state/action parts.

    weights[i]: [out_i, in_i] (PyTorch nn.Linear layout), biases[i]: [out_i].
    `param_dtype=jnp.bfloat16` halves weight footprint / DMA on v6e/v7x
    (keep f32 on v5e or when bit-matching an f32 reference); biases stay f32.
    """
    num_layers = len(weights)
    w0_t = jnp.transpose(weights[0]).astype(param_dtype)   # [S+A, H0]
    ws0 = w0_t[:state_dim, :]
    wa0 = w0_t[state_dim:, :]
    params = [ws0, wa0, biases[0].reshape(1, -1).astype(jnp.float32)]
    for w, b in zip(weights[1:], biases[1:]):
        params.append(jnp.transpose(w).astype(param_dtype))     # [in_i, out_i]
        params.append(b.reshape(1, -1).astype(jnp.float32))     # [1, out_i]
    out_dim = int(weights[-1].shape[0])
    return tuple(params), num_layers, out_dim


# --------------------------------------------------------------------------
# Batch tiling policy
# --------------------------------------------------------------------------
def _choose_batch_tiling(B, tile_b_max=1024, split_threshold=256):
    """Pick (tile_b, n_tiles, b_padded).

    * tile_b is a multiple of 8 (sublanes) and <= tile_b_max.
    * padding is only to the next multiple of 8 per tile, never a full tile.
    * batches larger than `split_threshold` get >= 2 grid steps so the
      "parallel" axis can shard across v7x's two TensorCores.
    """
    tile_b_max = max(8, _round_up(int(tile_b_max), 8))
    if B <= 8:
        tile_b = 8
    else:
        n_tiles = pl.cdiv(B, tile_b_max)
        if n_tiles < 2 and B > split_threshold:
            n_tiles = 2
        tile_b = _round_up(pl.cdiv(B, n_tiles), 8)
    n_tiles = pl.cdiv(B, tile_b)
    return tile_b, n_tiles, n_tiles * tile_b


# --------------------------------------------------------------------------
# Forward pass
# --------------------------------------------------------------------------
def critic_forward_prepared(state, action, prepared, *, tile_b_max=1024):
    """Fused Critic forward pass (single pallas_call) with prepped params."""
    params, num_layers, out_dim = prepared
    B, S = state.shape
    A = action.shape[1]

    tile_b, n_tiles, b_padded = _choose_batch_tiling(B, tile_b_max)
    if b_padded != B:
        state = jnp.pad(state, ((0, b_padded - B), (0, 0)))
        action = jnp.pad(action, ((0, b_padded - B), (0, 0)))

    def batch_spec(feat):
        return pl.BlockSpec((tile_b, feat), lambda i: (i, 0))

    def resident_spec(shape):
        return pl.BlockSpec(shape, lambda i: (0,) * len(shape))

    in_specs = ([batch_spec(S), batch_spec(A)]
                + [resident_spec(p.shape) for p in params])
    out_specs = batch_spec(out_dim)   # true width: full-array last dim block

    # VMEM budget: resident params are double-buffered by the pipeliner (2x),
    # plus a few tile_b x max_feat f32 activation buffers.  Cap by the actual
    # device capacity with headroom so it is safe on v7x (64 MiB) as well.
    param_bytes = sum(int(p.size) * p.dtype.itemsize for p in params)
    max_feat = max([int(p.shape[-1]) for p in params] + [S, A, out_dim])
    act_bytes = 4 * tile_b * max_feat
    want = 2 * param_bytes + 8 * act_bytes + (4 << 20)
    try:
        cap = int(pltpu.get_tpu_info().vmem_capacity_bytes)
    except Exception:
        cap = 64 << 20  # conservative (v7x per-TC VMEM)
    vmem_limit = int(min(max(want, 16 << 20), cap - (8 << 20)))
    # TODO(synk): for very large hidden dims, add pipeline_mode=pl.Buffered(1)
    # on the constant-index weight specs (or tile output features) to avoid
    # double-buffering resident weights.

    kernel = functools.partial(_critic_kernel, num_layers)

    out = pl.pallas_call(
        kernel,
        grid=(n_tiles,),
        in_specs=in_specs,
        out_specs=out_specs,
        out_shape=jax.ShapeDtypeStruct((b_padded, out_dim), state.dtype),
        compiler_params=pltpu.CompilerParams(
            dimension_semantics=("parallel",),  # batch tiles across TCs (v7x)
            vmem_limit_bytes=vmem_limit,
        ),
    )(state, action, *params)

    return out[:B] if b_padded != B else out


def critic_forward(state, action, weights, biases, *, tile_b_max=1024):
    """Convenience wrapper: preps params then runs the fused kernel."""
    prepared = prepare_critic_params(weights, biases, state.shape[1])
    return critic_forward_prepared(state, action, prepared,
                                   tile_b_max=tile_b_max)


# --------------------------------------------------------------------------
# Reference + synthetic init
# --------------------------------------------------------------------------
def init_critic_params(key, state_dim, action_dim, hidden_dim):
    """Deterministic synthetic init mirroring nn.Linear shapes."""
    input_dims = [state_dim + action_dim] + list(hidden_dim)
    output_dims = list(hidden_dim) + [action_dim]
    weights, biases = [], []
    for in_dim, out_dim in zip(input_dims, output_dims):
        key, kw, kb = jax.random.split(key, 3)
        bound = 1.0 / jnp.sqrt(jnp.float32(in_dim))
        w = jax.random.uniform(kw, (out_dim, in_dim), jnp.float32, -bound, bound)
        b = jax.random.uniform(kb, (out_dim,), jnp.float32, -bound, bound)
        weights.append(w)
        biases.append(b)
    return weights, biases


def critic_reference(state, action, weights, biases):
    """Pure-JAX reference matching the PyTorch module."""
    x = jnp.concatenate([state, action], axis=1)
    n = len(weights)
    for i, (w, b) in enumerate(zip(weights, biases)):
        x = x @ w.T + b
        if i < n - 1:
            x = jnp.where(x > 0, x, LEAKY_SLOPE * x)
    return x


if __name__ == "__main__":
    batch = 2
    state_dim = 8
    action_dim = 4
    hidden_dim = [32, 32]

    key = jax.random.PRNGKey(0)
    key, ks, ka, kp = jax.random.split(key, 4)
    state = jax.random.normal(ks, (batch, state_dim), jnp.float32)
    action = jax.random.normal(ka, (batch, action_dim), jnp.float32)
    weights, biases = init_critic_params(kp, state_dim, action_dim, hidden_dim)

    # Hoisted one-time parameter prep (transpose / split) out of the call path.
    prepared = prepare_critic_params(weights, biases, state_dim)

    out = critic_forward_prepared(state, action, prepared)
    out = jax.block_until_ready(out)

    ref = critic_reference(state, action, weights, biases)
    assert out.shape == (batch, action_dim), out.shape
    assert jnp.allclose(out, ref, atol=1e-4, rtol=1e-4), (out, ref)

    print("KERNEL_OK")
</pallas_src>

<mosaic_0001>
module attributes {stable_mosaic.version = 11 : i64} {
  func.func @_critic_kernel(%arg0: i32, %arg1: memref<8x8xf32, #tpu.memory_space<vmem>>, %arg2: memref<8x4xf32, #tpu.memory_space<vmem>>, %arg3: memref<8x32xf32, #tpu.memory_space<vmem>>, %arg4: memref<4x32xf32, #tpu.memory_space<vmem>>, %arg5: memref<1x32xf32, #tpu.memory_space<vmem>>, %arg6: memref<32x32xf32, #tpu.memory_space<vmem>>, %arg7: memref<1x32xf32, #tpu.memory_space<vmem>>, %arg8: memref<32x4xf32, #tpu.memory_space<vmem>>, %arg9: memref<1x4xf32, #tpu.memory_space<vmem>>, %arg10: memref<8x4xf32, #tpu.memory_space<vmem>>) attributes {dimension_semantics = [#tpu.dimension_semantics<parallel>], iteration_bounds = array<i64: 1>, scalar_prefetch = 0 : i64, scratch_operands = 0 : i64, tpu.core_type = #tpu.core_type<tc>, window_params = [{transform_indices = @transform_0, window_bounds = array<i64: 8, 8>}, {transform_indices = @transform_1, window_bounds = array<i64: 8, 4>}, {pipeline_mode = #tpu.pipeline_mode<synchronous>, transform_indices = @transform_2, window_bounds = array<i64: 8, 32>}, {pipeline_mode = #tpu.pipeline_mode<synchronous>, transform_indices = @transform_3, window_bounds = array<i64: 4, 32>}, {pipeline_mode = #tpu.pipeline_mode<synchronous>, transform_indices = @transform_4, window_bounds = array<i64: 1, 32>}, {pipeline_mode = #tpu.pipeline_mode<synchronous>, transform_indices = @transform_5, window_bounds = array<i64: 32, 32>}, {pipeline_mode = #tpu.pipeline_mode<synchronous>, transform_indices = @transform_6, window_bounds = array<i64: 1, 32>}, {pipeline_mode = #tpu.pipeline_mode<synchronous>, transform_indices = @transform_7, window_bounds = array<i64: 32, 4>}, {pipeline_mode = #tpu.pipeline_mode<synchronous>, transform_indices = @transform_8, window_bounds = array<i64: 1, 4>}, {transform_indices = @transform_9, window_bounds = array<i64: 8, 4>}]} {
    %c0 = arith.constant 0 : index
    %c0_0 = arith.constant 0 : index
    %0 = vector.load %arg1[%c0, %c0_0] : memref<8x8xf32, #tpu.memory_space<vmem>>, vector<8x8xf32>
    %c0_1 = arith.constant 0 : index
    %c0_2 = arith.constant 0 : index
    %1 = vector.load %arg3[%c0_1, %c0_2] : memref<8x32xf32, #tpu.memory_space<vmem>>, vector<8x32xf32>
    %cst = arith.constant dense<0.000000e+00> : vector<8x32xf32>
    %2 = tpu.matmul %0, %1, %cst {dimension_numbers = #tpu.dot_dimension_numbers<[1], [0], [0], [1], [0, 0, 1, 1], [], []>} : vector<8x8xf32>, vector<8x32xf32>, vector<8x32xf32> -> vector<8x32xf32>
    %c0_3 = arith.constant 0 : index
    %c0_4 = arith.constant 0 : index
    %3 = vector.load %arg2[%c0_3, %c0_4] : memref<8x4xf32, #tpu.memory_space<vmem>>, vector<8x4xf32>
    %c0_5 = arith.constant 0 : index
    %c0_6 = arith.constant 0 : index
    %4 = vector.load %arg4[%c0_5, %c0_6] : memref<4x32xf32, #tpu.memory_space<vmem>>, vector<4x32xf32>
    %cst_7 = arith.constant dense<0.000000e+00> : vector<8x32xf32>
    %5 = tpu.matmul %3, %4, %cst_7 {dimension_numbers = #tpu.dot_dimension_numbers<[1], [0], [0], [1], [0, 0, 1, 1], [], []>} : vector<8x4xf32>, vector<4x32xf32>, vector<8x32xf32> -> vector<8x32xf32>
    %6 = arith.addf %2, %5 : vector<8x32xf32>
    %c0_8 = arith.constant 0 : index
    %c0_9 = arith.constant 0 : index
    %7 = vector.load %arg5[%c0_8, %c0_9] : memref<1x32xf32, #tpu.memory_space<vmem>>, vector<1x32xf32>
    %8 = vector.broadcast %7 : vector<1x32xf32> to vector<8x32xf32>
    %9 = arith.addf %6, %8 : vector<8x32xf32>
    %cst_10 = arith.constant 0.00999999977 : f32
    %10 = vector.broadcast %cst_10 : f32 to vector<8x32xf32>
    %11 = arith.mulf %10, %9 : vector<8x32xf32>
    %12 = arith.maximumf %9, %11 : vector<8x32xf32>
    %c0_11 = arith.constant 0 : index
    %c0_12 = arith.constant 0 : index
    %13 = vector.load %arg6[%c0_11, %c0_12] : memref<32x32xf32, #tpu.memory_space<vmem>>, vector<32x32xf32>
    %c0_13 = arith.constant 0 : index
    %c0_14 = arith.constant 0 : index
    %14 = vector.load %arg7[%c0_13, %c0_14] : memref<1x32xf32, #tpu.memory_space<vmem>>, vector<1x32xf32>
    %cst_15 = arith.constant dense<0.000000e+00> : vector<8x32xf32>
    %15 = tpu.matmul %12, %13, %cst_15 {dimension_numbers = #tpu.dot_dimension_numbers<[1], [0], [0], [1], [0, 0, 1, 1], [], []>} : vector<8x32xf32>, vector<32x32xf32>, vector<8x32xf32> -> vector<8x32xf32>
    %16 = vector.broadcast %14 : vector<1x32xf32> to vector<8x32xf32>
    %17 = arith.addf %15, %16 : vector<8x32xf32>
    %cst_16 = arith.constant 0.00999999977 : f32
    %18 = vector.broadcast %cst_16 : f32 to vector<8x32xf32>
    %19 = arith.mulf %18, %17 : vector<8x32xf32>
    %20 = arith.maximumf %17, %19 : vector<8x32xf32>
    %c0_17 = arith.constant 0 : index
    %c0_18 = arith.constant 0 : index
    %21 = vector.load %arg8[%c0_17, %c0_18] : memref<32x4xf32, #tpu.memory_space<vmem>>, vector<32x4xf32>
    %c0_19 = arith.constant 0 : index
    %c0_20 = arith.constant 0 : index
    %22 = vector.load %arg9[%c0_19, %c0_20] : memref<1x4xf32, #tpu.memory_space<vmem>>, vector<1x4xf32>
    %cst_21 = arith.constant dense<0.000000e+00> : vector<8x4xf32>
    %23 = tpu.matmul %20, %21, %cst_21 {dimension_numbers = #tpu.dot_dimension_numbers<[1], [0], [0], [1], [0, 0, 1, 1], [], []>} : vector<8x32xf32>, vector<32x4xf32>, vector<8x4xf32> -> vector<8x4xf32>
    %24 = vector.broadcast %22 : vector<1x4xf32> to vector<8x4xf32>
    %25 = arith.addf %23, %24 : vector<8x4xf32>
    %c0_22 = arith.constant 0 : index
    %c0_23 = arith.constant 0 : index
    %26 = vector.load %arg10[%c0_22, %c0_23] : memref<8x4xf32, #tpu.memory_space<vmem>>, vector<8x4xf32>
    tpu.vector_store %arg10[%c0_22, %c0_23], %25 {strides = array<i32>} : memref<8x4xf32, #tpu.memory_space<vmem>>, vector<8x4xf32>,
    return
  }
  func.func @transform_0(%arg0: i32) -> (i32, i32) {
    %c0_i32 = arith.constant 0 : i32
    %c0_i32_0 = arith.constant 0 : i32
    return %arg0, %c0_i32 : i32, i32
  }
  func.func @transform_1(%arg0: i32) -> (i32, i32) {
    %c0_i32 = arith.constant 0 : i32
    %c0_i32_0 = arith.constant 0 : i32
    return %arg0, %c0_i32 : i32, i32
  }
  func.func @transform_2(%arg0: i32) -> (i32, i32) {
    %c0_i32 = arith.constant 0 : i32
    %c0_i32_0 = arith.constant 0 : i32
    %c0_i32_1 = arith.constant 0 : i32
    return %c0_i32, %c0_i32_0 : i32, i32
  }
  func.func @transform_3(%arg0: i32) -> (i32, i32) {
    %c0_i32 = arith.constant 0 : i32
    %c0_i32_0 = arith.constant 0 : i32
    %c0_i32_1 = arith.constant 0 : i32
    return %c0_i32, %c0_i32_0 : i32, i32
  }
  func.func @transform_4(%arg0: i32) -> (i32, i32) {
    %c0_i32 = arith.constant 0 : i32
    %c0_i32_0 = arith.constant 0 : i32
    %c0_i32_1 = arith.constant 0 : i32
    return %c0_i32, %c0_i32_0 : i32, i32
  }
  func.func @transform_5(%arg0: i32) -> (i32, i32) {
    %c0_i32 = arith.constant 0 : i32
    %c0_i32_0 = arith.constant 0 : i32
    %c0_i32_1 = arith.constant 0 : i32
    return %c0_i32, %c0_i32_0 : i32, i32
  }
  func.func @transform_6(%arg0: i32) -> (i32, i32) {
    %c0_i32 = arith.constant 0 : i32
    %c0_i32_0 = arith.constant 0 : i32
    %c0_i32_1 = arith.constant 0 : i32
    return %c0_i32, %c0_i32_0 : i32, i32
  }
  func.func @transform_7(%arg0: i32) -> (i32, i32) {
    %c0_i32 = arith.constant 0 : i32
    %c0_i32_0 = arith.constant 0 : i32
    %c0_i32_1 = arith.constant 0 : i32
    return %c0_i32, %c0_i32_0 : i32, i32
  }
  func.func @transform_8(%arg0: i32) -> (i32, i32) {
    %c0_i32 = arith.constant 0 : i32
    %c0_i32_0 = arith.constant 0 : i32
    %c0_i32_1 = arith.constant 0 : i32
    return %c0_i32, %c0_i32_0 : i32, i32
  }
  func.func @transform_9(%arg0: i32) -> (i32, i32) {
    %c0_i32 = arith.constant 0 : i32
    %c0_i32_0 = arith.constant 0 : i32
    return %arg0, %c0_i32 : i32, i32
  }
}

</mosaic_0001>

<bundles_post_ra>
// kernel: tpu_custom_call.1
= control target key start
LH: loop header
LB: loop body
LE: loop exit
PB: predicated region body
PF: predicated region fallthrough
CT: control target
= control target key end

     0   :  { %vm40_vm0 = vcmask 1043456   ;;  %v430_v0 = vmov 0.0   ;;  %vm36_vm1 = vcmask 31744   ;;  %vm114_vm2 = vcmask 64512   ;;  %s534_s3 = inlined_call_operand.vmem [shape: f32[4,32], index: 3, kind: input, shape index: {}]   ;;  %s535_s2 = inlined_call_operand.vmem [shape: f32[8,32], index: 2, kind: input, shape index: {}]   ;;  %s536_s1 = inlined_call_operand.vmem [shape: f32[8,4], index: 1, kind: input, shape index: {}]   ;;  %s537_s0 = inlined_call_operand.vmem [shape: f32[8,8], index: 0, kind: input, shape index: {}]   ;;  %s538_s5 = inlined_call_operand.vmem [shape: f32[32,32], index: 5, kind: input, shape index: {}]   ;;  %s539_s4 = inlined_call_operand.vmem [shape: f32[1,32], index: 4, kind: input, shape index: {}]   ;;  %s540_s7 = inlined_call_operand.vmem [shape: f32[32,4], index: 7, kind: input, shape index: {}]   ;;  %s541_s6 = inlined_call_operand.vmem [shape: f32[1,32], index: 6, kind: input, shape index: {}]   ;;  %s542_s8 = inlined_call_operand.vmem [shape: f32[1,4], index: 8, kind: input, shape index: {}]   ;;  %s543_s9 = inlined_call_operand.vmem [shape: f32[8,4], index: 9, kind: output, shape index: {}]  }
   0x1   :  { %396 = vmatprep.subr.mxu0 %v430_v0  ;;  %401 = vmatprep.subr.mxu1 %v430_v0  ;;  %v35_v1 = vld [vmem:[%s534_s3] sm:$0xf]  ;;  %vm431_vm3 = vmmov 0   ;;  %v201_v5 = vld [vmem:[%s538_s5 + $0x18] sm:$0xff]  ;;  %v200_v6 = vld [vmem:[%s538_s5 + $0x10] sm:$0xff]  ;;  %vm209_vm4 = vcmask 261120  }
   0x2   :  { %v33_v2 = vld [vmem:[%s535_s2] sm:$0xff]  ;;  %397 = vmatpush3.msk.msra.mxu0 %vm40_vm0, %v35_v1  ;;  %398 = vmatprep.mubr.msk.f32.mxu0 %vm431_vm3, %v430_v0  ;;  %v199_v7 = vld [vmem:[%s538_s5 + $0x8] sm:$0xff]  ;;  %v288_v18 = vld [vmem:[%s540_s7 + $0x18] sm:$0xff] }
   0x3   :  { %v34_v3 = vld [vmem:[%s536_s1] sm:$0xff]  ;;  %402 = vmatpush3.msra.mxu1 %v33_v2  ;;  %403 = vmatprep.mubr.msk.f32.mxu1 %vm431_vm3, %v430_v0  ;;  %v287_v19 = vld [vmem:[%s540_s7 + $0x10] sm:$0xff]  ;;  %v286_v20 = vld [vmem:[%s540_s7 + $0x8] sm:$0xff] }
   0x4   :  { %v32_v4 = vld [vmem:[%s537_s0] sm:$0xff]  ;;  %399 = vmatmul.mubr.msk.f32.vlgmr.msra.gmra.mxu0 %vm36_vm1, %v34_v3  ;;  %406 = vmatprep.subr.mxu0 %v430_v0 }
   0x5   :  { %404 = vmatmul.mubr.msk.f32.vlgmr.msra.gmra.mxu1 %vm114_vm2, %v32_v4  ;;  %414 = vmatprep.mubr.msk.f32.mxu0 %vm431_vm3, %v430_v0  ;;  %v198_v8 = vld [vmem:[%s538_s5] sm:$0xff] }
   0x6   :  { %417 = vmatprep.subr.mxu1 %v430_v0  ;;  %425 = vmatprep.mubr.msk.f32.mxu1 %vm431_vm3, %v430_v0  ;;  %v377_v11 = vld [vmem:[%s539_s4] ss:$0 sm:$0xff] }
   0x7   :  { %407 = vmatpush3.msra.mxu0 %v201_v5  ;;  %418 = vmatpush3.msra.mxu1 %v288_v18  ;;  %v285_v21 = vld [vmem:[%s540_s7] sm:$0xff] }
   0x8   :  { %408 = vmatprep.subr.mxu0 %v430_v0  ;;  %419 = vmatprep.subr.mxu1 %v430_v0  ;;  %v378_v22 = vld [vmem:[%s541_s6] ss:$0 sm:$0xff] }
   0x9   :  { %409 = vmatpush3.msra.mxu0 %v200_v6  ;;  %420 = vmatpush3.msra.mxu1 %v287_v19  ;;  %v380_v28 = vld [vmem:[%s542_s8] ss:$0 sm:$0xff] }
   0xa   :  { %410 = vmatprep.subr.mxu0 %v430_v0  ;;  %421 = vmatprep.subr.mxu1 %v430_v0 }
   0xb   :  { %411 = vmatpush3.msra.mxu0 %v199_v7  ;;  %422 = vmatpush3.msra.mxu1 %v286_v20 }
   0xc   :  { %412 = vmatprep.subr.mxu0 %v430_v0  ;;  %423 = vmatprep.subr.mxu1 %v430_v0 }
   0xd   :  { %413 = vmatpush3.msra.mxu0 %v198_v8  ;;  %424 = vmatpush3.msra.mxu1 %v285_v21 }
  0xc4   :  { %v110_v9 = vpop.f32.mrf.mxu0 }
  0xc5   :  { %v184_v10 = vpop.f32.mrf.mxu1 }
  0xc6   :  { %v185_v12 = vadd.f32 %v184_v10, %v110_v9  ;;  %v400_v13 = vpop.f32.mrf.mxu0 }
  0xc7   :  { %v405_v14 = vpop.f32.mrf.mxu1 }
  0xc8   :  { %v195_v15 = vadd.f32 %v377_v11, %v185_v12 }
  0xca   :  { %v196_v16 = vmul.f32 0.01, %v195_v15 }
  0xcc   :  { %v197_v17 = vmax.f32 %v195_v15, %v196_v16 }
  0xce   :  { %415 = vmatmul.mubr.msk.f32.vlgmr.msra.gmra.mxu0 %vm209_vm4, %v197_v17 }
 0x18e   :  { %v279_v23 = vpop.f32.mrf.mxu0 }
 0x18f   :  { %v280_v24 = vadd.f32 %v378_v22, %v279_v23 }
 0x190   :  { %v416_v25 = vpop.f32.mrf.mxu0 }
 0x191   :  { %v283_v26 = vmul.f32 0.01, %v280_v24 }
 0x193   :  { %v284_v27 = vmax.f32 %v280_v24, %v283_v26 }
 0x195   :  { %426 = vmatmul.mubr.msk.f32.vlgmr.msra.gmra.mxu1 %vm209_vm4, %v284_v27 }
 0x255   :  { %v365_v29 = vpop.f32.mrf.mxu1 }
 0x256   :  { %v366_v30 = vadd.f32 %v380_v28, %v365_v29 }
 0x257   :  { %v427_v31 = vpop.f32.mrf.mxu1 }
 0x258   :  { %369 = vst.msk [vmem:[%s543_s9] sm:$0xff] %vm36_vm1, %v366_v30 }

</bundles_post_ra>
